<compile_context>
chip_gen: v5e
topology: v5e:2x2
jax: 0.10.0
libtpu: 0.0.40
codegen_flags: <defaults>
</compile_context>

<pallas_src>
import math

import jax
import jax.numpy as jnp
from jax.experimental import pallas as pl
from jax.experimental.pallas import tpu as pltpu

ENCODER_REGULAR_VTH = 0.999  # parity with the PyTorch source (unused in the uniform-spike path)

# lowbias32 hash constants, expressed as signed 32-bit values.
_HASH_M1 = 0x7FEB352D
_HASH_M2 = 0x846CA68B - (1 << 32)
_GOLDEN = 0x9E3779B9 - (1 << 32)
_U24_MASK = 0x00FFFFFF


def _srl32(x, k):
    """Logical right shift for int32 (arithmetic shift + mask -> bit-exact)."""
    return jnp.bitwise_and(jnp.right_shift(x, k), jnp.int32((1 << (32 - k)) - 1))


def _hash32(x):
    """lowbias32 avalanche hash on int32 (same bits as the uint32 reference)."""
    x = x ^ _srl32(x, 16)
    x = x * jnp.int32(_HASH_M1)
    x = x ^ _srl32(x, 15)
    x = x * jnp.int32(_HASH_M2)
    x = x ^ _srl32(x, 16)
    return x


def _encoder_kernel(seed_ref, obs_ref, mean_ref, gain_ref, out_ref):
    """One grid step == one batch tile, ALL spike timesteps.

    seed_ref : (1,)               int32  SMEM (scalar prefetch)
    obs_ref  : (B_TILE, N_pad)    f32    observation repeated over pop_dim
    mean_ref : (1, N_pad)         f32    population means, flattened
    gain_ref : (1, N_pad)         f32    precomputed -0.5 / std^2
    out_ref  : (T, B_TILE, N_pad) f32    spikes
    """
    T, B_TILE, N_pad = out_ref.shape

    # ---- timestep-invariant work: done exactly once per batch tile -------------
    diff = obs_ref[...] - mean_ref[...]                       # (B_TILE, N_pad)
    pop_act = jnp.exp(diff * diff * gain_ref[...])            # in (0, 1]; single EUP pass
    # Integer thresholds: P(spike) = thresh / 2^24 ~= pop_act (2^-24 quantization).
    thresh = (pop_act * jnp.float32(1 << 24)).astype(jnp.int32)

    # Unique per-element counter base: ((b_global * T + t) * N_pad + n).
    b_off = pl.program_id(0) * B_TILE
    b_idx = jax.lax.broadcasted_iota(jnp.int32, (B_TILE, N_pad), 0) + b_off
    n_idx = jax.lax.broadcasted_iota(jnp.int32, (B_TILE, N_pad), 1)
    base = b_idx * jnp.int32(T * N_pad) + n_idx               # (B_TILE, N_pad)
    seed_mix = seed_ref[0] * jnp.int32(_GOLDEN)               # scalar seed decorrelation

    # ---- per-timestep work: integer hash + compare + lane-dense store ----------
    for t in range(T):  # T is small and static -> unrolled, full scheduler visibility
        h = _hash32((base + jnp.int32(t * N_pad)) ^ seed_mix)
        u24 = jnp.bitwise_and(h, jnp.int32(_U24_MASK))        # uniform in [0, 2^24)
        out_ref[t] = jnp.where(u24 < thresh, jnp.float32(1.0), jnp.float32(0.0))


def _round_up(x, m):
    return ((x + m - 1) // m) * m


def pop_spike_encoder_uniform(obs, mean, std, spike_ts, seed=0):
    """JAX wrapper reproducing PopSpikeEncoderUniformSpike.forward.

    obs  : (B, obs_dim) float32
    mean : (1, obs_dim, pop_dim) float32   (nn.Parameter equivalent)
    std  : (1, obs_dim, pop_dim) float32   (nn.Parameter equivalent)
    returns pop_spikes : (B, obs_dim*pop_dim, spike_ts) float32 (binary)
    """
    B, obs_dim = obs.shape
    pop_dim = mean.shape[-1]
    N = obs_dim * pop_dim

    N_pad = _round_up(N, 128)   # lane-dense stores
    B_pad = _round_up(B, 8)     # sublane alignment
    if B_pad <= 512:
        B_TILE = B_pad          # single batch tile
    else:
        B_TILE = 512            # multiple of 8; keeps double-buffered blocks small
        B_pad = _round_up(B_pad, B_TILE)
    num_b_tiles = B_pad // B_TILE
    # TODO(synk): for very large spike_ts * B_TILE * N_pad also tile the timestep
    # axis and set vmem_limit_bytes explicitly (v7x has only 64 MiB VMEM).

    f32 = jnp.float32
    # obs.view(-1, obs_dim, 1) broadcast over pop_dim, flattened and padded.
    obs_rep = jnp.repeat(obs.astype(f32), pop_dim, axis=1)                       # (B, N)
    obs_rep = jnp.pad(obs_rep, ((0, B_pad - B), (0, N_pad - N)))
    mean_flat = jnp.pad(mean.reshape(1, N).astype(f32), ((0, 0), (0, N_pad - N)))
    # Fold the per-element divide out of the kernel: gain = -0.5 / std^2.
    gain = (-0.5 / (std.astype(f32) * std.astype(f32))).reshape(1, N)
    gain_flat = jnp.pad(gain, ((0, 0), (0, N_pad - N)))
    seed_arr = jnp.array([seed], dtype=jnp.int32)

    out = pl.pallas_call(
        _encoder_kernel,
        out_shape=jax.ShapeDtypeStruct((spike_ts, B_pad, N_pad), jnp.float32),
        grid_spec=pltpu.PrefetchScalarGridSpec(
            num_scalar_prefetch=1,
            grid=(num_b_tiles,),
            in_specs=[
                pl.BlockSpec((B_TILE, N_pad), lambda b, seed: (b, 0)),
                pl.BlockSpec((1, N_pad), lambda b, seed: (0, 0)),
                pl.BlockSpec((1, N_pad), lambda b, seed: (0, 0)),
            ],
            out_specs=pl.BlockSpec((spike_ts, B_TILE, N_pad),
                                   lambda b, seed: (0, b, 0)),
        ),
        compiler_params=pltpu.CompilerParams(
            # Batch tiles are fully independent -> both TensorCores on v7x.
            dimension_semantics=("parallel",),
        ),
        cost_estimate=pl.CostEstimate(
            flops=int(B_pad) * int(N_pad) * (8 + 16 * int(spike_ts)),
            transcendentals=int(B_pad) * int(N_pad),
            bytes_accessed=4 * (int(B_pad) * int(N_pad) + 2 * int(N_pad)
                                + int(spike_ts) * int(B_pad) * int(N_pad)),
        ),
    )(seed_arr, obs_rep, mean_flat, gain_flat)

    # (T, B_pad, N_pad) -> (B, N, spike_ts) to match the PyTorch output layout.
    # TODO(synk): drop this transpose if downstream can consume (T, B, N) directly.
    return jnp.transpose(out[:, :B, :N], (1, 2, 0))


def init_encoder_params(obs_dim, pop_dim, mean_range, std):
    """Deterministic parameter init matching PopSpikeEncoderRegularSpike.__init__."""
    if pop_dim > 1:
        delta_mean = (mean_range[1] - mean_range[0]) / (pop_dim - 1)
        means = mean_range[0] + delta_mean * jnp.arange(pop_dim, dtype=jnp.float32)
        tmp_mean = jnp.broadcast_to(means[None, None, :], (1, obs_dim, pop_dim))
    else:
        tmp_mean = jnp.zeros((1, obs_dim, pop_dim), dtype=jnp.float32)
    tmp_std = jnp.full((1, obs_dim, pop_dim), std, dtype=jnp.float32)
    return tmp_mean, tmp_std


if __name__ == "__main__":
    batch = 2
    obs_dim = 4
    pop_dim = 8
    spike_ts = 8
    mean_range = (-3.0, 3.0)
    std = math.sqrt(0.15)

    key = jax.random.PRNGKey(0)
    obs = jax.random.normal(key, (batch, obs_dim), dtype=jnp.float32)

    mean_p, std_p = init_encoder_params(obs_dim, pop_dim, mean_range, std)

    pop_spikes = pop_spike_encoder_uniform(obs, mean_p, std_p, spike_ts, seed=0)
    pop_spikes = jax.block_until_ready(pop_spikes)

    # Shape / dtype / binary checks.
    assert pop_spikes.shape == (batch, obs_dim * pop_dim, spike_ts)
    assert pop_spikes.dtype == jnp.float32
    assert bool(jnp.all((pop_spikes == 0.0) | (pop_spikes == 1.0)))

    # Statistical check: mean spike rate must track the Gaussian population
    # activation (the module's per-neuron spike probability).
    pop_act_ref = jnp.exp(
        -0.5 * (obs[:, :, None] - mean_p) ** 2 / (std_p ** 2)
    ).reshape(batch, obs_dim * pop_dim)
    rate = pop_spikes.mean(axis=-1)
    assert abs(float(rate.mean()) - float(pop_act_ref.mean())) < 0.12

    print("KERNEL_OK")
</pallas_src>

<mosaic_0001>
module attributes {stable_mosaic.version = 11 : i64} {
  func.func @_encoder_kernel(%arg0: i32, %arg1: memref<1xi32, #tpu.memory_space<smem>>, %arg2: memref<8x128xf32, #tpu.memory_space<vmem>>, %arg3: memref<1x128xf32, #tpu.memory_space<vmem>>, %arg4: memref<1x128xf32, #tpu.memory_space<vmem>>, %arg5: memref<8x8x128xf32, #tpu.memory_space<vmem>>) attributes {dimension_semantics = [#tpu.dimension_semantics<parallel>], iteration_bounds = array<i64: 1>, scalar_prefetch = 1 : i64, scratch_operands = 0 : i64, tpu.core_type = #tpu.core_type<tc>, window_params = [{transform_indices = @transform_0, window_bounds = array<i64: 8, 128>}, {pipeline_mode = #tpu.pipeline_mode<synchronous>, transform_indices = @transform_1, window_bounds = array<i64: 1, 128>}, {pipeline_mode = #tpu.pipeline_mode<synchronous>, transform_indices = @transform_2, window_bounds = array<i64: 1, 128>}, {transform_indices = @transform_3, window_bounds = array<i64: 8, 8, 128>}]} {
    %c0 = arith.constant 0 : index
    %c0_0 = arith.constant 0 : index
    %0 = vector.load %arg2[%c0, %c0_0] : memref<8x128xf32, #tpu.memory_space<vmem>>, vector<8x128xf32>
    %c0_1 = arith.constant 0 : index
    %c0_2 = arith.constant 0 : index
    %1 = vector.load %arg3[%c0_1, %c0_2] : memref<1x128xf32, #tpu.memory_space<vmem>>, vector<1x128xf32>
    %2 = vector.broadcast %1 : vector<1x128xf32> to vector<8x128xf32>
    %3 = arith.subf %0, %2 : vector<8x128xf32>
    %4 = arith.mulf %3, %3 : vector<8x128xf32>
    %c0_3 = arith.constant 0 : index
    %c0_4 = arith.constant 0 : index
    %5 = vector.load %arg4[%c0_3, %c0_4] : memref<1x128xf32, #tpu.memory_space<vmem>>, vector<1x128xf32>
    %6 = vector.broadcast %5 : vector<1x128xf32> to vector<8x128xf32>
    %7 = arith.mulf %4, %6 : vector<8x128xf32>
    %8 = math.exp %7 : vector<8x128xf32>
    %cst = arith.constant 0x4B800000 : f32
    %9 = vector.broadcast %cst : f32 to vector<8x128xf32>
    %10 = arith.mulf %8, %9 : vector<8x128xf32>
    %11 = arith.fptosi %10 : vector<8x128xf32> to vector<8x128xi32>
    %c8_i32 = arith.constant 8 : i32
    %12 = arith.muli %arg0, %c8_i32 : i32
    %13 = tpu.iota {dimensions = array<i32: 0>} : vector<8x128xi32>
    %14 = vector.broadcast %12 : i32 to vector<8x128xi32>
    %15 = arith.addi %13, %14 : vector<8x128xi32>
    %16 = tpu.iota {dimensions = array<i32: 1>} : vector<8x128xi32>
    %c1024_i32 = arith.constant 1024 : i32
    %17 = vector.broadcast %c1024_i32 : i32 to vector<8x128xi32>
    %18 = arith.muli %15, %17 : vector<8x128xi32>
    %19 = arith.addi %18, %16 : vector<8x128xi32>
    %c0_5 = arith.constant 0 : index
    %20 = memref.load %arg1[%c0_5] : memref<1xi32, #tpu.memory_space<smem>>
    %c-1640531527_i32 = arith.constant -1640531527 : i32
    %21 = arith.muli %20, %c-1640531527_i32 : i32
    %c0_i32 = arith.constant 0 : i32
    %22 = vector.broadcast %c0_i32 : i32 to vector<8x128xi32>
    %23 = arith.addi %19, %22 : vector<8x128xi32>
    %24 = vector.broadcast %21 : i32 to vector<8x128xi32>
    %25 = arith.xori %23, %24 : vector<8x128xi32>
    %c16_i32 = arith.constant 16 : i32
    %26 = vector.broadcast %c16_i32 : i32 to vector<8x128xi32>
    %27 = arith.shrsi %25, %26 : vector<8x128xi32>
    %c65535_i32 = arith.constant 65535 : i32
    %28 = vector.broadcast %c65535_i32 : i32 to vector<8x128xi32>
    %29 = arith.andi %27, %28 : vector<8x128xi32>
    %30 = arith.xori %25, %29 : vector<8x128xi32>
    %c2146121005_i32 = arith.constant 2146121005 : i32
    %31 = vector.broadcast %c2146121005_i32 : i32 to vector<8x128xi32>
    %32 = arith.muli %30, %31 : vector<8x128xi32>
    %c15_i32 = arith.constant 15 : i32
    %33 = vector.broadcast %c15_i32 : i32 to vector<8x128xi32>
    %34 = arith.shrsi %32, %33 : vector<8x128xi32>
    %c131071_i32 = arith.constant 131071 : i32
    %35 = vector.broadcast %c131071_i32 : i32 to vector<8x128xi32>
    %36 = arith.andi %34, %35 : vector<8x128xi32>
    %37 = arith.xori %32, %36 : vector<8x128xi32>
    %c-2073254261_i32 = arith.constant -2073254261 : i32
    %38 = vector.broadcast %c-2073254261_i32 : i32 to vector<8x128xi32>
    %39 = arith.muli %37, %38 : vector<8x128xi32>
    %c16_i32_6 = arith.constant 16 : i32
    %40 = vector.broadcast %c16_i32_6 : i32 to vector<8x128xi32>
    %41 = arith.shrsi %39, %40 : vector<8x128xi32>
    %c65535_i32_7 = arith.constant 65535 : i32
    %42 = vector.broadcast %c65535_i32_7 : i32 to vector<8x128xi32>
    %43 = arith.andi %41, %42 : vector<8x128xi32>
    %44 = arith.xori %39, %43 : vector<8x128xi32>
    %c16777215_i32 = arith.constant 16777215 : i32
    %45 = vector.broadcast %c16777215_i32 : i32 to vector<8x128xi32>
    %46 = arith.andi %44, %45 : vector<8x128xi32>
    %47 = arith.cmpi slt, %46, %11 : vector<8x128xi32>
    %cst_8 = arith.constant 1.000000e+00 : f32
    %cst_9 = arith.constant 0.000000e+00 : f32
    %48 = vector.broadcast %cst_8 : f32 to vector<8x128xf32>
    %49 = vector.broadcast %cst_9 : f32 to vector<8x128xf32>
    %50 = arith.select %47, %48, %49 : vector<8x128xi1>, vector<8x128xf32>
    %c0_10 = arith.constant 0 : index
    %c0_11 = arith.constant 0 : index
    %c0_12 = arith.constant 0 : index
    %51 = vector.load %arg5[%c0_10, %c0_11, %c0_12] : memref<8x8x128xf32, #tpu.memory_space<vmem>>, vector<1x8x128xf32>
    %52 = vector.shape_cast %51 : vector<1x8x128xf32> to vector<8x128xf32>
    %53 = vector.shape_cast %50 : vector<8x128xf32> to vector<1x8x128xf32>
    tpu.vector_store %arg5[%c0_10, %c0_11, %c0_12], %53 {strides = array<i32>} : memref<8x8x128xf32, #tpu.memory_space<vmem>>, vector<1x8x128xf32>,
    %c128_i32 = arith.constant 128 : i32
    %54 = vector.broadcast %c128_i32 : i32 to vector<8x128xi32>
    %55 = arith.addi %19, %54 : vector<8x128xi32>
    %56 = vector.broadcast %21 : i32 to vector<8x128xi32>
    %57 = arith.xori %55, %56 : vector<8x128xi32>
    %c16_i32_13 = arith.constant 16 : i32
    %58 = vector.broadcast %c16_i32_13 : i32 to vector<8x128xi32>
    %59 = arith.shrsi %57, %58 : vector<8x128xi32>
    %c65535_i32_14 = arith.constant 65535 : i32
    %60 = vector.broadcast %c65535_i32_14 : i32 to vector<8x128xi32>
    %61 = arith.andi %59, %60 : vector<8x128xi32>
    %62 = arith.xori %57, %61 : vector<8x128xi32>
    %c2146121005_i32_15 = arith.constant 2146121005 : i32
    %63 = vector.broadcast %c2146121005_i32_15 : i32 to vector<8x128xi32>
    %64 = arith.muli %62, %63 : vector<8x128xi32>
    %c15_i32_16 = arith.constant 15 : i32
    %65 = vector.broadcast %c15_i32_16 : i32 to vector<8x128xi32>
    %66 = arith.shrsi %64, %65 : vector<8x128xi32>
    %c131071_i32_17 = arith.constant 131071 : i32
    %67 = vector.broadcast %c131071_i32_17 : i32 to vector<8x128xi32>
    %68 = arith.andi %66, %67 : vector<8x128xi32>
    %69 = arith.xori %64, %68 : vector<8x128xi32>
    %c-2073254261_i32_18 = arith.constant -2073254261 : i32
    %70 = vector.broadcast %c-2073254261_i32_18 : i32 to vector<8x128xi32>
    %71 = arith.muli %69, %70 : vector<8x128xi32>
    %c16_i32_19 = arith.constant 16 : i32
    %72 = vector.broadcast %c16_i32_19 : i32 to vector<8x128xi32>
    %73 = arith.shrsi %71, %72 : vector<8x128xi32>
    %c65535_i32_20 = arith.constant 65535 : i32
    %74 = vector.broadcast %c65535_i32_20 : i32 to vector<8x128xi32>
    %75 = arith.andi %73, %74 : vector<8x128xi32>
    %76 = arith.xori %71, %75 : vector<8x128xi32>
    %c16777215_i32_21 = arith.constant 16777215 : i32
    %77 = vector.broadcast %c16777215_i32_21 : i32 to vector<8x128xi32>
    %78 = arith.andi %76, %77 : vector<8x128xi32>
    %79 = arith.cmpi slt, %78, %11 : vector<8x128xi32>
    %cst_22 = arith.constant 1.000000e+00 : f32
    %cst_23 = arith.constant 0.000000e+00 : f32
    %80 = vector.broadcast %cst_22 : f32 to vector<8x128xf32>
    %81 = vector.broadcast %cst_23 : f32 to vector<8x128xf32>
    %82 = arith.select %79, %80, %81 : vector<8x128xi1>, vector<8x128xf32>
    %c1 = arith.constant 1 : index
    %c0_24 = arith.constant 0 : index
    %c0_25 = arith.constant 0 : index
    %83 = vector.load %arg5[%c1, %c0_24, %c0_25] : memref<8x8x128xf32, #tpu.memory_space<vmem>>, vector<1x8x128xf32>
    %84 = vector.shape_cast %83 : vector<1x8x128xf32> to vector<8x128xf32>
    %85 = vector.shape_cast %82 : vector<8x128xf32> to vector<1x8x128xf32>
    tpu.vector_store %arg5[%c1, %c0_24, %c0_25], %85 {strides = array<i32>} : memref<8x8x128xf32, #tpu.memory_space<vmem>>, vector<1x8x128xf32>,
    %c256_i32 = arith.constant 256 : i32
    %86 = vector.broadcast %c256_i32 : i32 to vector<8x128xi32>
    %87 = arith.addi %19, %86 : vector<8x128xi32>
    %88 = vector.broadcast %21 : i32 to vector<8x128xi32>
    %89 = arith.xori %87, %88 : vector<8x128xi32>
    %c16_i32_26 = arith.constant 16 : i32
    %90 = vector.broadcast %c16_i32_26 : i32 to vector<8x128xi32>
    %91 = arith.shrsi %89, %90 : vector<8x128xi32>
    %c65535_i32_27 = arith.constant 65535 : i32
    %92 = vector.broadcast %c65535_i32_27 : i32 to vector<8x128xi32>
    %93 = arith.andi %91, %92 : vector<8x128xi32>
    %94 = arith.xori %89, %93 : vector<8x128xi32>
    %c2146121005_i32_28 = arith.constant 2146121005 : i32
    %95 = vector.broadcast %c2146121005_i32_28 : i32 to vector<8x128xi32>
    %96 = arith.muli %94, %95 : vector<8x128xi32>
    %c15_i32_29 = arith.constant 15 : i32
    %97 = vector.broadcast %c15_i32_29 : i32 to vector<8x128xi32>
    %98 = arith.shrsi %96, %97 : vector<8x128xi32>
    %c131071_i32_30 = arith.constant 131071 : i32
    %99 = vector.broadcast %c131071_i32_30 : i32 to vector<8x128xi32>
    %100 = arith.andi %98, %99 : vector<8x128xi32>
    %101 = arith.xori %96, %100 : vector<8x128xi32>
    %c-2073254261_i32_31 = arith.constant -2073254261 : i32
    %102 = vector.broadcast %c-2073254261_i32_31 : i32 to vector<8x128xi32>
    %103 = arith.muli %101, %102 : vector<8x128xi32>
    %c16_i32_32 = arith.constant 16 : i32
    %104 = vector.broadcast %c16_i32_32 : i32 to vector<8x128xi32>
    %105 = arith.shrsi %103, %104 : vector<8x128xi32>
    %c65535_i32_33 = arith.constant 65535 : i32
    %106 = vector.broadcast %c65535_i32_33 : i32 to vector<8x128xi32>
    %107 = arith.andi %105, %106 : vector<8x128xi32>
    %108 = arith.xori %103, %107 : vector<8x128xi32>
    %c16777215_i32_34 = arith.constant 16777215 : i32
    %109 = vector.broadcast %c16777215_i32_34 : i32 to vector<8x128xi32>
    %110 = arith.andi %108, %109 : vector<8x128xi32>
    %111 = arith.cmpi slt, %110, %11 : vector<8x128xi32>
    %cst_35 = arith.constant 1.000000e+00 : f32
    %cst_36 = arith.constant 0.000000e+00 : f32
    %112 = vector.broadcast %cst_35 : f32 to vector<8x128xf32>
    %113 = vector.broadcast %cst_36 : f32 to vector<8x128xf32>
    %114 = arith.select %111, %112, %113 : vector<8x128xi1>, vector<8x128xf32>
    %c2 = arith.constant 2 : index
    %c0_37 = arith.constant 0 : index
    %c0_38 = arith.constant 0 : index
    %115 = vector.load %arg5[%c2, %c0_37, %c0_38] : memref<8x8x128xf32, #tpu.memory_space<vmem>>, vector<1x8x128xf32>
    %116 = vector.shape_cast %115 : vector<1x8x128xf32> to vector<8x128xf32>
    %117 = vector.shape_cast %114 : vector<8x128xf32> to vector<1x8x128xf32>
    tpu.vector_store %arg5[%c2, %c0_37, %c0_38], %117 {strides = array<i32>} : memref<8x8x128xf32, #tpu.memory_space<vmem>>, vector<1x8x128xf32>,
    %c384_i32 = arith.constant 384 : i32
    %118 = vector.broadcast %c384_i32 : i32 to vector<8x128xi32>
    %119 = arith.addi %19, %118 : vector<8x128xi32>
    %120 = vector.broadcast %21 : i32 to vector<8x128xi32>
    %121 = arith.xori %119, %120 : vector<8x128xi32>
    %c16_i32_39 = arith.constant 16 : i32
    %122 = vector.broadcast %c16_i32_39 : i32 to vector<8x128xi32>
    %123 = arith.shrsi %121, %122 : vector<8x128xi32>
    %c65535_i32_40 = arith.constant 65535 : i32
    %124 = vector.broadcast %c65535_i32_40 : i32 to vector<8x128xi32>
    %125 = arith.andi %123, %124 : vector<8x128xi32>
    %126 = arith.xori %121, %125 : vector<8x128xi32>
    %c2146121005_i32_41 = arith.constant 2146121005 : i32
    %127 = vector.broadcast %c2146121005_i32_41 : i32 to vector<8x128xi32>
    %128 = arith.muli %126, %127 : vector<8x128xi32>
    %c15_i32_42 = arith.constant 15 : i32
    %129 = vector.broadcast %c15_i32_42 : i32 to vector<8x128xi32>
    %130 = arith.shrsi %128, %129 : vector<8x128xi32>
    %c131071_i32_43 = arith.constant 131071 : i32
    %131 = vector.broadcast %c131071_i32_43 : i32 to vector<8x128xi32>
    %132 = arith.andi %130, %131 : vector<8x128xi32>
    %133 = arith.xori %128, %132 : vector<8x128xi32>
    %c-2073254261_i32_44 = arith.constant -2073254261 : i32
    %134 = vector.broadcast %c-2073254261_i32_44 : i32 to vector<8x128xi32>
    %135 = arith.muli %133, %134 : vector<8x128xi32>
    %c16_i32_45 = arith.constant 16 : i32
    %136 = vector.broadcast %c16_i32_45 : i32 to vector<8x128xi32>
    %137 = arith.shrsi %135, %136 : vector<8x128xi32>
    %c65535_i32_46 = arith.constant 65535 : i32
    %138 = vector.broadcast %c65535_i32_46 : i32 to vector<8x128xi32>
    %139 = arith.andi %137, %138 : vector<8x128xi32>
    %140 = arith.xori %135, %139 : vector<8x128xi32>
    %c16777215_i32_47 = arith.constant 16777215 : i32
    %141 = vector.broadcast %c16777215_i32_47 : i32 to vector<8x128xi32>
    %142 = arith.andi %140, %141 : vector<8x128xi32>
    %143 = arith.cmpi slt, %142, %11 : vector<8x128xi32>
    %cst_48 = arith.constant 1.000000e+00 : f32
    %cst_49 = arith.constant 0.000000e+00 : f32
    %144 = vector.broadcast %cst_48 : f32 to vector<8x128xf32>
    %145 = vector.broadcast %cst_49 : f32 to vector<8x128xf32>
    %146 = arith.select %143, %144, %145 : vector<8x128xi1>, vector<8x128xf32>
    %c3 = arith.constant 3 : index
    %c0_50 = arith.constant 0 : index
    %c0_51 = arith.constant 0 : index
    %147 = vector.load %arg5[%c3, %c0_50, %c0_51] : memref<8x8x128xf32, #tpu.memory_space<vmem>>, vector<1x8x128xf32>
    %148 = vector.shape_cast %147 : vector<1x8x128xf32> to vector<8x128xf32>
    %149 = vector.shape_cast %146 : vector<8x128xf32> to vector<1x8x128xf32>
    tpu.vector_store %arg5[%c3, %c0_50, %c0_51], %149 {strides = array<i32>} : memref<8x8x128xf32, #tpu.memory_space<vmem>>, vector<1x8x128xf32>,
    %c512_i32 = arith.constant 512 : i32
    %150 = vector.broadcast %c512_i32 : i32 to vector<8x128xi32>
    %151 = arith.addi %19, %150 : vector<8x128xi32>
    %152 = vector.broadcast %21 : i32 to vector<8x128xi32>
    %153 = arith.xori %151, %152 : vector<8x128xi32>
    %c16_i32_52 = arith.constant 16 : i32
    %154 = vector.broadcast %c16_i32_52 : i32 to vector<8x128xi32>
    %155 = arith.shrsi %153, %154 : vector<8x128xi32>
    %c65535_i32_53 = arith.constant 65535 : i32
    %156 = vector.broadcast %c65535_i32_53 : i32 to vector<8x128xi32>
    %157 = arith.andi %155, %156 : vector<8x128xi32>
    %158 = arith.xori %153, %157 : vector<8x128xi32>
    %c2146121005_i32_54 = arith.constant 2146121005 : i32
    %159 = vector.broadcast %c2146121005_i32_54 : i32 to vector<8x128xi32>
    %160 = arith.muli %158, %159 : vector<8x128xi32>
    %c15_i32_55 = arith.constant 15 : i32
    %161 = vector.broadcast %c15_i32_55 : i32 to vector<8x128xi32>
    %162 = arith.shrsi %160, %161 : vector<8x128xi32>
    %c131071_i32_56 = arith.constant 131071 : i32
    %163 = vector.broadcast %c131071_i32_56 : i32 to vector<8x128xi32>
    %164 = arith.andi %162, %163 : vector<8x128xi32>
    %165 = arith.xori %160, %164 : vector<8x128xi32>
    %c-2073254261_i32_57 = arith.constant -2073254261 : i32
    %166 = vector.broadcast %c-2073254261_i32_57 : i32 to vector<8x128xi32>
    %167 = arith.muli %165, %166 : vector<8x128xi32>
    %c16_i32_58 = arith.constant 16 : i32
    %168 = vector.broadcast %c16_i32_58 : i32 to vector<8x128xi32>
    %169 = arith.shrsi %167, %168 : vector<8x128xi32>
    %c65535_i32_59 = arith.constant 65535 : i32
    %170 = vector.broadcast %c65535_i32_59 : i32 to vector<8x128xi32>
    %171 = arith.andi %169, %170 : vector<8x128xi32>
    %172 = arith.xori %167, %171 : vector<8x128xi32>
    %c16777215_i32_60 = arith.constant 16777215 : i32
    %173 = vector.broadcast %c16777215_i32_60 : i32 to vector<8x128xi32>
    %174 = arith.andi %172, %173 : vector<8x128xi32>
    %175 = arith.cmpi slt, %174, %11 : vector<8x128xi32>
    %cst_61 = arith.constant 1.000000e+00 : f32
    %cst_62 = arith.constant 0.000000e+00 : f32
    %176 = vector.broadcast %cst_61 : f32 to vector<8x128xf32>
    %177 = vector.broadcast %cst_62 : f32 to vector<8x128xf32>
    %178 = arith.select %175, %176, %177 : vector<8x128xi1>, vector<8x128xf32>
    %c4 = arith.constant 4 : index
    %c0_63 = arith.constant 0 : index
    %c0_64 = arith.constant 0 : index
    %179 = vector.load %arg5[%c4, %c0_63, %c0_64] : memref<8x8x128xf32, #tpu.memory_space<vmem>>, vector<1x8x128xf32>
    %180 = vector.shape_cast %179 : vector<1x8x128xf32> to vector<8x128xf32>
    %181 = vector.shape_cast %178 : vector<8x128xf32> to vector<1x8x128xf32>
    tpu.vector_store %arg5[%c4, %c0_63, %c0_64], %181 {strides = array<i32>} : memref<8x8x128xf32, #tpu.memory_space<vmem>>, vector<1x8x128xf32>,
    %c640_i32 = arith.constant 640 : i32
    %182 = vector.broadcast %c640_i32 : i32 to vector<8x128xi32>
    %183 = arith.addi %19, %182 : vector<8x128xi32>
    %184 = vector.broadcast %21 : i32 to vector<8x128xi32>
    %185 = arith.xori %183, %184 : vector<8x128xi32>
    %c16_i32_65 = arith.constant 16 : i32
    %186 = vector.broadcast %c16_i32_65 : i32 to vector<8x128xi32>
    %187 = arith.shrsi %185, %186 : vector<8x128xi32>
    %c65535_i32_66 = arith.constant 65535 : i32
    %188 = vector.broadcast %c65535_i32_66 : i32 to vector<8x128xi32>
    %189 = arith.andi %187, %188 : vector<8x128xi32>
    %190 = arith.xori %185, %189 : vector<8x128xi32>
    %c2146121005_i32_67 = arith.constant 2146121005 : i32
    %191 = vector.broadcast %c2146121005_i32_67 : i32 to vector<8x128xi32>
    %192 = arith.muli %190, %191 : vector<8x128xi32>
    %c15_i32_68 = arith.constant 15 : i32
    %193 = vector.broadcast %c15_i32_68 : i32 to vector<8x128xi32>
    %194 = arith.shrsi %192, %193 : vector<8x128xi32>
    %c131071_i32_69 = arith.constant 131071 : i32
    %195 = vector.broadcast %c131071_i32_69 : i32 to vector<8x128xi32>
    %196 = arith.andi %194, %195 : vector<8x128xi32>
    %197 = arith.xori %192, %196 : vector<8x128xi32>
    %c-2073254261_i32_70 = arith.constant -2073254261 : i32
    %198 = vector.broadcast %c-2073254261_i32_70 : i32 to vector<8x128xi32>
    %199 = arith.muli %197, %198 : vector<8x128xi32>
    %c16_i32_71 = arith.constant 16 : i32
    %200 = vector.broadcast %c16_i32_71 : i32 to vector<8x128xi32>
    %201 = arith.shrsi %199, %200 : vector<8x128xi32>
    %c65535_i32_72 = arith.constant 65535 : i32
    %202 = vector.broadcast %c65535_i32_72 : i32 to vector<8x128xi32>
    %203 = arith.andi %201, %202 : vector<8x128xi32>
    %204 = arith.xori %199, %203 : vector<8x128xi32>
    %c16777215_i32_73 = arith.constant 16777215 : i32
    %205 = vector.broadcast %c16777215_i32_73 : i32 to vector<8x128xi32>
    %206 = arith.andi %204, %205 : vector<8x128xi32>
    %207 = arith.cmpi slt, %206, %11 : vector<8x128xi32>
    %cst_74 = arith.constant 1.000000e+00 : f32
    %cst_75 = arith.constant 0.000000e+00 : f32
    %208 = vector.broadcast %cst_74 : f32 to vector<8x128xf32>
    %209 = vector.broadcast %cst_75 : f32 to vector<8x128xf32>
    %210 = arith.select %207, %208, %209 : vector<8x128xi1>, vector<8x128xf32>
    %c5 = arith.constant 5 : index
    %c0_76 = arith.constant 0 : index
    %c0_77 = arith.constant 0 : index
    %211 = vector.load %arg5[%c5, %c0_76, %c0_77] : memref<8x8x128xf32, #tpu.memory_space<vmem>>, vector<1x8x128xf32>
    %212 = vector.shape_cast %211 : vector<1x8x128xf32> to vector<8x128xf32>
    %213 = vector.shape_cast %210 : vector<8x128xf32> to vector<1x8x128xf32>
    tpu.vector_store %arg5[%c5, %c0_76, %c0_77], %213 {strides = array<i32>} : memref<8x8x128xf32, #tpu.memory_space<vmem>>, vector<1x8x128xf32>,
    %c768_i32 = arith.constant 768 : i32
    %214 = vector.broadcast %c768_i32 : i32 to vector<8x128xi32>
    %215 = arith.addi %19, %214 : vector<8x128xi32>
    %216 = vector.broadcast %21 : i32 to vector<8x128xi32>
    %217 = arith.xori %215, %216 : vector<8x128xi32>
    %c16_i32_78 = arith.constant 16 : i32
    %218 = vector.broadcast %c16_i32_78 : i32 to vector<8x128xi32>
    %219 = arith.shrsi %217, %218 : vector<8x128xi32>
    %c65535_i32_79 = arith.constant 65535 : i32
    %220 = vector.broadcast %c65535_i32_79 : i32 to vector<8x128xi32>
    %221 = arith.andi %219, %220 : vector<8x128xi32>
    %222 = arith.xori %217, %221 : vector<8x128xi32>
    %c2146121005_i32_80 = arith.constant 2146121005 : i32
    %223 = vector.broadcast %c2146121005_i32_80 : i32 to vector<8x128xi32>
    %224 = arith.muli %222, %223 : vector<8x128xi32>
    %c15_i32_81 = arith.constant 15 : i32
    %225 = vector.broadcast %c15_i32_81 : i32 to vector<8x128xi32>
    %226 = arith.shrsi %224, %225 : vector<8x128xi32>
    %c131071_i32_82 = arith.constant 131071 : i32
    %227 = vector.broadcast %c131071_i32_82 : i32 to vector<8x128xi32>
    %228 = arith.andi %226, %227 : vector<8x128xi32>
    %229 = arith.xori %224, %228 : vector<8x128xi32>
    %c-2073254261_i32_83 = arith.constant -2073254261 : i32
    %230 = vector.broadcast %c-2073254261_i32_83 : i32 to vector<8x128xi32>
    %231 = arith.muli %229, %230 : vector<8x128xi32>
    %c16_i32_84 = arith.constant 16 : i32
    %232 = vector.broadcast %c16_i32_84 : i32 to vector<8x128xi32>
    %233 = arith.shrsi %231, %232 : vector<8x128xi32>
    %c65535_i32_85 = arith.constant 65535 : i32
    %234 = vector.broadcast %c65535_i32_85 : i32 to vector<8x128xi32>
    %235 = arith.andi %233, %234 : vector<8x128xi32>
    %236 = arith.xori %231, %235 : vector<8x128xi32>
    %c16777215_i32_86 = arith.constant 16777215 : i32
    %237 = vector.broadcast %c16777215_i32_86 : i32 to vector<8x128xi32>
    %238 = arith.andi %236, %237 : vector<8x128xi32>
    %239 = arith.cmpi slt, %238, %11 : vector<8x128xi32>
    %cst_87 = arith.constant 1.000000e+00 : f32
    %cst_88 = arith.constant 0.000000e+00 : f32
    %240 = vector.broadcast %cst_87 : f32 to vector<8x128xf32>
    %241 = vector.broadcast %cst_88 : f32 to vector<8x128xf32>
    %242 = arith.select %239, %240, %241 : vector<8x128xi1>, vector<8x128xf32>
    %c6 = arith.constant 6 : index
    %c0_89 = arith.constant 0 : index
    %c0_90 = arith.constant 0 : index
    %243 = vector.load %arg5[%c6, %c0_89, %c0_90] : memref<8x8x128xf32, #tpu.memory_space<vmem>>, vector<1x8x128xf32>
    %244 = vector.shape_cast %243 : vector<1x8x128xf32> to vector<8x128xf32>
    %245 = vector.shape_cast %242 : vector<8x128xf32> to vector<1x8x128xf32>
    tpu.vector_store %arg5[%c6, %c0_89, %c0_90], %245 {strides = array<i32>} : memref<8x8x128xf32, #tpu.memory_space<vmem>>, vector<1x8x128xf32>,
    %c896_i32 = arith.constant 896 : i32
    %246 = vector.broadcast %c896_i32 : i32 to vector<8x128xi32>
    %247 = arith.addi %19, %246 : vector<8x128xi32>
    %248 = vector.broadcast %21 : i32 to vector<8x128xi32>
    %249 = arith.xori %247, %248 : vector<8x128xi32>
    %c16_i32_91 = arith.constant 16 : i32
    %250 = vector.broadcast %c16_i32_91 : i32 to vector<8x128xi32>
    %251 = arith.shrsi %249, %250 : vector<8x128xi32>
    %c65535_i32_92 = arith.constant 65535 : i32
    %252 = vector.broadcast %c65535_i32_92 : i32 to vector<8x128xi32>
    %253 = arith.andi %251, %252 : vector<8x128xi32>
    %254 = arith.xori %249, %253 : vector<8x128xi32>
    %c2146121005_i32_93 = arith.constant 2146121005 : i32
    %255 = vector.broadcast %c2146121005_i32_93 : i32 to vector<8x128xi32>
    %256 = arith.muli %254, %255 : vector<8x128xi32>
    %c15_i32_94 = arith.constant 15 : i32
    %257 = vector.broadcast %c15_i32_94 : i32 to vector<8x128xi32>
    %258 = arith.shrsi %256, %257 : vector<8x128xi32>
    %c131071_i32_95 = arith.constant 131071 : i32
    %259 = vector.broadcast %c131071_i32_95 : i32 to vector<8x128xi32>
    %260 = arith.andi %258, %259 : vector<8x128xi32>
    %261 = arith.xori %256, %260 : vector<8x128xi32>
    %c-2073254261_i32_96 = arith.constant -2073254261 : i32
    %262 = vector.broadcast %c-2073254261_i32_96 : i32 to vector<8x128xi32>
    %263 = arith.muli %261, %262 : vector<8x128xi32>
    %c16_i32_97 = arith.constant 16 : i32
    %264 = vector.broadcast %c16_i32_97 : i32 to vector<8x128xi32>
    %265 = arith.shrsi %263, %264 : vector<8x128xi32>
    %c65535_i32_98 = arith.constant 65535 : i32
    %266 = vector.broadcast %c65535_i32_98 : i32 to vector<8x128xi32>
    %267 = arith.andi %265, %266 : vector<8x128xi32>
    %268 = arith.xori %263, %267 : vector<8x128xi32>
    %c16777215_i32_99 = arith.constant 16777215 : i32
    %269 = vector.broadcast %c16777215_i32_99 : i32 to vector<8x128xi32>
    %270 = arith.andi %268, %269 : vector<8x128xi32>
    %271 = arith.cmpi slt, %270, %11 : vector<8x128xi32>
    %cst_100 = arith.constant 1.000000e+00 : f32
    %cst_101 = arith.constant 0.000000e+00 : f32
    %272 = vector.broadcast %cst_100 : f32 to vector<8x128xf32>
    %273 = vector.broadcast %cst_101 : f32 to vector<8x128xf32>
    %274 = arith.select %271, %272, %273 : vector<8x128xi1>, vector<8x128xf32>
    %c7 = arith.constant 7 : index
    %c0_102 = arith.constant 0 : index
    %c0_103 = arith.constant 0 : index
    %275 = vector.load %arg5[%c7, %c0_102, %c0_103] : memref<8x8x128xf32, #tpu.memory_space<vmem>>, vector<1x8x128xf32>
    %276 = vector.shape_cast %275 : vector<1x8x128xf32> to vector<8x128xf32>
    %277 = vector.shape_cast %274 : vector<8x128xf32> to vector<1x8x128xf32>
    tpu.vector_store %arg5[%c7, %c0_102, %c0_103], %277 {strides = array<i32>} : memref<8x8x128xf32, #tpu.memory_space<vmem>>, vector<1x8x128xf32>,
    return
  }
  func.func @transform_0(%arg0: i32, %arg1: memref<1xi32, #tpu.memory_space<smem>>) -> (i32, i32) {
    %c0_i32 = arith.constant 0 : i32
    %c0_i32_0 = arith.constant 0 : i32
    return %arg0, %c0_i32 : i32, i32
  }
  func.func @transform_1(%arg0: i32, %arg1: memref<1xi32, #tpu.memory_space<smem>>) -> (i32, i32) {
    %c0_i32 = arith.constant 0 : i32
    %c0_i32_0 = arith.constant 0 : i32
    %c0_i32_1 = arith.constant 0 : i32
    return %c0_i32, %c0_i32_0 : i32, i32
  }
  func.func @transform_2(%arg0: i32, %arg1: memref<1xi32, #tpu.memory_space<smem>>) -> (i32, i32) {
    %c0_i32 = arith.constant 0 : i32
    %c0_i32_0 = arith.constant 0 : i32
    %c0_i32_1 = arith.constant 0 : i32
    return %c0_i32, %c0_i32_0 : i32, i32
  }
  func.func @transform_3(%arg0: i32, %arg1: memref<1xi32, #tpu.memory_space<smem>>) -> (i32, i32, i32) {
    %c0_i32 = arith.constant 0 : i32
    %c0_i32_0 = arith.constant 0 : i32
    %c0_i32_1 = arith.constant 0 : i32
    return %c0_i32, %arg0, %c0_i32_0 : i32, i32, i32
  }
}

</mosaic_0001>

<bundles_post_ra>
// kernel: tpu_custom_call.1
= control target key start
LH: loop header
LB: loop body
LE: loop exit
PB: predicated region body
PF: predicated region fallthrough
CT: control target
= control target key end

     0   :  { %10 = vsyncpa [#allocation5], 0  ;;  %s365_s0 = inlined_call_operand.<no memory space> [shape: s32[1], index: 0, kind: input, shape index: {}]   ;;  %s366_s1 = inlined_call_operand.hbm [shape: f32[8,128], index: 1, kind: input, shape index: {}]   ;;  %s367_s2 = inlined_call_operand.vmem [shape: f32[1,128], index: 2, kind: input, shape index: {}]   ;;  %s368_s3 = inlined_call_operand.vmem [shape: f32[1,128], index: 3, kind: input, shape index: {}]   ;;  %s369_s4 = inlined_call_operand.hbm [shape: f32[8,8,128], index: 4, kind: output, shape index: {}]  }
   0x1   :  { %11 = vsyncpa [#allocation6], 0  ;;  %s17_s17 = sshll.u32 %s366_s1, 4  ;;  %s310_s18 = smov [#allocation4]   ;;  %s18_s17 = int_to_ptr.hbm [resolvable:$true] %s17_s17 }
   0x2   :  { %s19_s19 = sshll.u32 %s310_s18, 4  ;;  %s20_s19 = int_to_ptr.vmem [resolvable:$true] %s19_s19 }
   0x3   :  { %22 = dma.hbm_to_vmem [thread:$0]  %s18_s17, 128, %s20_s19, [#allocation5]  }
   0x4   :  { %306 = dma.done.wait [#allocation5], 128  }
   0x5   :  { %307 = vsyncadd [#allocation5], 4294967168  ;;  %v48_v0 = vlaneseq  ;;  %s57_s22 = smul.u32 2654435769, %s365_s0  ;;  %v31_v6 = vld [vmem:[#allocation4] sm:$0xff]  ;;  %s312_s0 = smov [#allocation7]  }
   0x6   :  { %v254_v7 = vld [vmem:[%s367_s2] ss:$0 sm:$0xff]  ;;  %s205_s2 = sshll.u32 %s312_s0, 4  ;;  %s207_s27 = sshll.u32 %s369_s4, 4  ;;  %s206_s2 = int_to_ptr.vmem [resolvable:$true] %s205_s2  ;;  %s208_s27 = int_to_ptr.hbm [resolvable:$true] %s207_s27 }
   0x7   :  { %v49_v1 = vshrl.u32 %v48_v0, 7  ;;  %v53_v2 = vand.u32 127, %v48_v0  ;;  %v346_v4 = vstv %s57_s22  ;;  %v36_v11 = vsub.f32 %v31_v6, %v254_v7  ;;  %v255_v12 = vld [vmem:[%s368_s3] ss:$0 sm:$0xff]  ;;  %s313_s28 = smov 128   ;;  %s314_s29 = smov 8  }
   0x9   :  { %v54_v3 = vmul.u32 1024, %v49_v1  ;;  %v37_v20 = vmul.f32 %v36_v11, %v36_v11 }
   0xb   :  { %v55_v5 = vadd.s32 %v54_v3, %v53_v2  ;;  %v42_v28 = vmul.f32 %v255_v12, %v37_v20 }
   0xd   :  { %v59_v8 = vxor.u32 %v346_v4, %v55_v5  ;;  %v75_v9 = vadd.s32 128, %v55_v5  ;;  %v93_v10 = vadd.s32 256, %v55_v5  ;;  %v111_v13 = vadd.s32 384, %v55_v5 }
   0xe   :  { %v129_v14 = vadd.s32 512, %v55_v5  ;;  %v147_v15 = vadd.s32 640, %v55_v5  ;;  %v165_v19 = vadd.s32 768, %v55_v5  ;;  %v43_v36 = vmul.f32 1.442695, %v42_v28 }
   0xf   :  { %v220_v16 = vshrl.u32 %v59_v8, 16  ;;  %v76_v17 = vxor.u32 %v75_v9, %v346_v4  ;;  %v94_v18 = vxor.u32 %v93_v10, %v346_v4  ;;  %v112_v21 = vxor.u32 %v111_v13, %v346_v4 }
  0x10   :  { %v130_v22 = vxor.u32 %v129_v14, %v346_v4  ;;  %v148_v23 = vxor.u32 %v147_v15, %v346_v4  ;;  %v166_v27 = vxor.u32 %v165_v19, %v346_v4  ;;  %256 = vpow2.f32 %v43_v36 }
  0x11   :  { %v62_v24 = vxor.u32 %v220_v16, %v59_v8  ;;  %v223_v25 = vshrl.u32 %v76_v17, 16  ;;  %v226_v26 = vshrl.u32 %v94_v18, 16  ;;  %v229_v29 = vshrl.u32 %v112_v21, 16 }
  0x12   :  { %v232_v30 = vshrl.u32 %v130_v22, 16  ;;  %v235_v31 = vshrl.u32 %v148_v23, 16  ;;  %v238_v35 = vshrl.u32 %v166_v27, 16  ;;  %v183_v54 = vadd.s32 896, %v55_v5 }
  0x13   :  { %v63_v32 = vmul.u32 2146121005, %v62_v24  ;;  %v79_v33 = vxor.u32 %v223_v25, %v76_v17  ;;  %v97_v34 = vxor.u32 %v226_v26, %v94_v18  ;;  %v115_v37 = vxor.u32 %v229_v29, %v112_v21 }
  0x14   :  { %v133_v38 = vxor.u32 %v232_v30, %v130_v22  ;;  %v151_v39 = vxor.u32 %v235_v31, %v148_v23  ;;  %v169_v43 = vxor.u32 %v238_v35, %v166_v27  ;;  %v184_v8 = vxor.u32 %v183_v54, %v346_v4 }
  0x15   :  { %v221_v40 = vshrl.u32 %v63_v32, 15  ;;  %v80_v41 = vmul.u32 2146121005, %v79_v33  ;;  %v98_v42 = vmul.u32 2146121005, %v97_v34  ;;  %v311_v34 = vmov 0.0  }
  0x16   :  { %v116_v44 = vmul.u32 2146121005, %v115_v37  ;;  %v134_v45 = vmul.u32 2146121005, %v133_v38  ;;  %v152_v46 = vmul.u32 2146121005, %v151_v39  ;;  %v257_v2 = vpop.eup %256 }
  0x17   :  { %v66_v47 = vxor.u32 %v221_v40, %v63_v32  ;;  %v224_v48 = vshrl.u32 %v80_v41, 15  ;;  %v227_v49 = vshrl.u32 %v98_v42, 15  ;;  %v170_v50 = vmul.u32 2146121005, %v169_v43 }
  0x18   :  { %v230_v51 = vshrl.u32 %v116_v44, 15  ;;  %v233_v52 = vshrl.u32 %v134_v45, 15  ;;  %v236_v53 = vshrl.u32 %v152_v46, 15  ;;  %v45_v9 = vmul.f32 16777216.0, %v257_v2 }
  0x19   :  { %v67_v55 = vmul.u32 2221713035, %v66_v47  ;;  %v83_v56 = vxor.u32 %v224_v48, %v80_v41  ;;  %v101_v57 = vxor.u32 %v227_v49, %v98_v42  ;;  %v239_v58 = vshrl.u32 %v170_v50, 15 }
  0x1a   :  { %v119_v59 = vxor.u32 %v230_v51, %v116_v44  ;;  %v137_v60 = vxor.u32 %v233_v52, %v134_v45  ;;  %v155_v61 = vxor.u32 %v236_v53, %v152_v46  ;;  %vm244_vm0 = vcmp.lt.s32.totalorder %v45_v9, 0 }
  0x1b   :  { %v222_v62 = vshrl.u32 %v67_v55, 16  ;;  %v84_v63 = vmul.u32 2221713035, %v83_v56  ;;  %v102_v0 = vmul.u32 2221713035, %v101_v57  ;;  %v173_v1 = vxor.u32 %v239_v58, %v170_v50 }
  0x1c   :  { %v120_v3 = vmul.u32 2221713035, %v119_v59  ;;  %v138_v6 = vmul.u32 2221713035, %v137_v60  ;;  %v156_v7 = vmul.u32 2221713035, %v155_v61  ;;  %v245_v16 = vceil.f32 %v45_v9 }
  0x1d   :  { %v70_v10 = vxor.u32 %v222_v62, %v67_v55  ;;  %v225_v5 = vshrl.u32 %v84_v63, 16  ;;  %v228_v11 = vshrl.u32 %v102_v0, 16  ;;  %v174_v15 = vmul.u32 2221713035, %v173_v1 }
  0x1e   :  { %v231_v12 = vshrl.u32 %v120_v3, 16  ;;  %v234_v13 = vshrl.u32 %v138_v6, 16  ;;  %v237_v14 = vshrl.u32 %v156_v7, 16  ;;  %v246_v17 = vfloor.f32 %v45_v9 }
  0x1f   :  { %v71_v18 = vand.u32 16777215, %v70_v10  ;;  %v87_v19 = vxor.u32 %v225_v5, %v84_v63  ;;  %v105_v20 = vxor.u32 %v228_v11, %v102_v0  ;;  %v240_v25 = vshrl.u32 %v174_v15, 16 }
  0x20   :  { %v123_v21 = vxor.u32 %v231_v12, %v120_v3  ;;  %v141_v22 = vxor.u32 %v234_v13, %v138_v6  ;;  %v247_v23 = vsel %vm244_vm0, %v245_v16, %v246_v17  ;;  %v159_v24 = vxor.u32 %v237_v14, %v156_v7 }
  0x21   :  { %v241_v4 = vshrl.u32 %v184_v8, 16  ;;  %v248_v26 = vcvt.f32.s32 %v247_v23  ;;  %v88_v27 = vand.u32 16777215, %v87_v19  ;;  %v106_v28 = vand.u32 16777215, %v105_v20 }
  0x22   :  { %v124_v29 = vand.u32 16777215, %v123_v21  ;;  %v142_v30 = vand.u32 16777215, %v141_v22  ;;  %v160_v31 = vand.u32 16777215, %v159_v24  ;;  %v177_v32 = vxor.u32 %v240_v25, %v174_v15 }
  0x23   :  { %v187_v33 = vxor.u32 %v241_v4, %v184_v8  ;;  %vm72_vm1 = vcmp.lt.s32.totalorder %v71_v18, %v248_v26  ;;  %vm89_vm2 = vcmp.lt.s32.totalorder %v88_v27, %v248_v26  ;;  %vm107_vm3 = vcmp.lt.s32.totalorder %v106_v28, %v248_v26 }
  0x24   :  { %vm125_vm4 = vcmp.lt.s32.totalorder %v124_v29, %v248_v26  ;;  %v73_v35 = vsel %vm72_vm1, 1.0, %v311_v34  ;;  %v90_v36 = vsel %vm89_vm2, 1.0, %v311_v34  ;;  %v108_v37 = vsel %vm107_vm3, 1.0, %v311_v34 }
  0x25   :  { %v126_v38 = vsel %vm125_vm4, 1.0, %v311_v34  ;;  %74 = vst [vmem:[#allocation7] sm:$0xff] %v73_v35  ;;  %vm143_vm5 = vcmp.lt.s32.totalorder %v142_v30, %v248_v26  ;;  %vm161_vm6 = vcmp.lt.s32.totalorder %v160_v31, %v248_v26  ;;  %v178_v39 = vand.u32 16777215, %v177_v32 }
  0x26   :  { %v188_v40 = vmul.u32 2146121005, %v187_v33  ;;  %92 = vst [vmem:[#allocation7 + $0x8] sm:$0xff] %v90_v36  ;;  %v144_v41 = vsel %vm143_vm5, 1.0, %v311_v34  ;;  %v162_v42 = vsel %vm161_vm6, 1.0, %v311_v34 }
  0x27   :  { %110 = vst [vmem:[#allocation7 + $0x10] sm:$0xff] %v108_v37  ;;  %vm179_vm7 = vcmp.lt.s32.totalorder %v178_v39, %v248_v26 }
  0x28   :  { %v242_v43 = vshrl.u32 %v188_v40, 15  ;;  %128 = vst [vmem:[#allocation7 + $0x18] sm:$0xff] %v126_v38  ;;  %v180_v44 = vsel %vm179_vm7, 1.0, %v311_v34 }
  0x29   :  { %146 = vst [vmem:[#allocation7 + $0x20] sm:$0xff] %v144_v41 }
  0x2a   :  { %v191_v45 = vxor.u32 %v242_v43, %v188_v40  ;;  %164 = vst [vmem:[#allocation7 + $0x28] sm:$0xff] %v162_v42 }
  0x2b   :  { %182 = vst [vmem:[#allocation7 + $0x30] sm:$0xff] %v180_v44 }
  0x2c   :  { %v192_v46 = vmul.u32 2221713035, %v191_v45 }
  0x2e   :  { %v243_v47 = vshrl.u32 %v192_v46, 16 }
  0x30   :  { %v195_v48 = vxor.u32 %v243_v47, %v192_v46 }
  0x32   :  { %v196_v49 = vand.u32 16777215, %v195_v48 }
  0x34   :  { %vm197_vm8 = vcmp.lt.s32.totalorder %v196_v49, %v248_v26 }
  0x35   :  { %v198_v50 = vsel %vm197_vm8, 1.0, %v311_v34 }
  0x36   :  { %200 = vst [vmem:[#allocation7 + $0x38] sm:$0xff] %v198_v50 }
  0x37   :  { %213 = dma.vmem_to_hbm [thread:$0]  %s206_s2, 1024, %s208_s27, [#allocation6], %s313_s28, %s313_s28, %s314_s29  }
  0x38   :  { %308 = dma.done.wait [#allocation6], 1024  }
  0x39   :  { %309 = vsyncadd [#allocation6], 4294966272 }
  0x3a   :  { %218 = vsyncpa [#allocation5], 1 }
  0x3b   :  { %219 = vsyncpa [#allocation6], 1 }

</bundles_post_ra>
